<compile_context>
chip_gen: v7x
topology: tpu7x:2x2x1
jax: 0.10.0
libtpu: 0.0.40
codegen_flags: <defaults>
</compile_context>

<pallas_src>
import functools

import jax
import jax.numpy as jnp
from jax.experimental import pallas as pl
from jax.experimental.pallas import tpu as pltpu


def _round_up(x, m):
    return ((x + m - 1) // m) * m


def _round_down(x, m):
    return (x // m) * m


# ---------------------------------------------------------------------------
# Kernels
# ---------------------------------------------------------------------------

def _mlp_kernel_split4(h_ref, t_ref, w1h_ref, w1t_ref, w1a_ref, w1p_ref,
                       b1_ref, w2_ref, b2_ref, o_ref, acc_ref):
    """General path (hs not a multiple of 128): four accumulated K=hs dots."""
    j = pl.program_id(1)

    h = h_ref[...]
    t = t_ref[...]
    d = jnp.abs(h - t)
    p = h * t

    cdt = w1h_ref.dtype  # MXU compute dtype (bf16), f32 accumulation below.
    z1 = jnp.dot(h.astype(cdt), w1h_ref[...], preferred_element_type=jnp.float32)
    z1 = z1 + jnp.dot(t.astype(cdt), w1t_ref[...], preferred_element_type=jnp.float32)
    z1 = z1 + jnp.dot(d.astype(cdt), w1a_ref[...], preferred_element_type=jnp.float32)
    z1 = z1 + jnp.dot(p.astype(cdt), w1p_ref[...], preferred_element_type=jnp.float32)
    z1 = z1 + b1_ref[...]

    # TODO(synk): dropout is identity here (eval mode); training-mode dropout
    # would build a mask with pltpu.prng_seed + pltpu.prng_random_bits.
    a = jnp.maximum(z1, 0.0).astype(w2_ref.dtype)
    partial = jnp.dot(a, w2_ref[...], preferred_element_type=jnp.float32)

    @pl.when(j == 0)
    def _():
        acc_ref[...] = jnp.zeros_like(acc_ref)

    acc_ref[...] += partial

    @pl.when(j == pl.num_programs(1) - 1)
    def _():
        o_ref[...] = (acc_ref[...] + b2_ref[...]).astype(o_ref.dtype)


def _mlp_kernel_merged(h_ref, t_ref, w1x_ref, w1y_ref,
                       b1_ref, w2_ref, b2_ref, o_ref,
                       x1_ref, x2_ref, acc_ref, *, hs):
    """hs % 128 == 0 path: two K=2*hs dots fed from bf16 VMEM scratch."""
    j = pl.program_id(1)
    cdt = w1x_ref.dtype

    @pl.when(j == 0)
    def _():
        h = h_ref[...]
        t = t_ref[...]
        # 128-aligned lane offsets -> plain aligned vector stores (no XLU).
        x1_ref[:, pl.ds(0, hs)] = h.astype(cdt)
        x1_ref[:, pl.ds(hs, hs)] = t.astype(cdt)
        x2_ref[:, pl.ds(0, hs)] = jnp.abs(h - t).astype(cdt)
        x2_ref[:, pl.ds(hs, hs)] = (h * t).astype(cdt)
        acc_ref[...] = jnp.zeros_like(acc_ref)

    z1 = jnp.dot(x1_ref[...], w1x_ref[...], preferred_element_type=jnp.float32)
    z1 = z1 + jnp.dot(x2_ref[...], w1y_ref[...], preferred_element_type=jnp.float32)
    z1 = z1 + b1_ref[...]

    # TODO(synk): dropout identity (eval mode).
    a = jnp.maximum(z1, 0.0).astype(w2_ref.dtype)
    acc_ref[...] += jnp.dot(a, w2_ref[...], preferred_element_type=jnp.float32)

    @pl.when(j == pl.num_programs(1) - 1)
    def _():
        o_ref[...] = (acc_ref[...] + b2_ref[...]).astype(o_ref.dtype)


# ---------------------------------------------------------------------------
# Wrapper
# ---------------------------------------------------------------------------

def mlp_forward(head_rep, tail_rep, w1, b1, w2, b2, *,
                compute_dtype=jnp.bfloat16, tile_n=None, h1_tile=None):
    """head_rep/tail_rep: (N, hs); w1: (4*hs, 2*hs); w2: (2*hs, outdim)."""
    N, hs = head_rep.shape
    in1, h1 = w1.shape
    h2, outdim = w2.shape
    assert in1 == 4 * hs and h2 == h1

    in_bytes = head_rep.dtype.itemsize
    c_bytes = jnp.dtype(compute_dtype).itemsize
    out_dtype = head_rep.dtype
    out_bytes = jnp.dtype(out_dtype).itemsize

    # ---- VMEM ceiling: 75% of per-core capacity (~48 MiB v7x, ~96 MiB v5e/v6e)
    try:
        vmem_cap = int(pltpu.get_tpu_info().vmem_capacity_bytes)
    except Exception:
        vmem_cap = 64 * 1024 * 1024          # conservative (v7x-sized) fallback
    vmem_ceiling = (3 * vmem_cap) // 4

    # ---- lane-dense output padding ------------------------------------------
    out_pad = _round_up(outdim, 128)
    # NOTE: if downstream accepts bf16 logits, switching out_dtype to bf16
    # halves the padded writeback (worthwhile when outdim << 128, esp. on v5e).

    # ---- h1 (=2*hs) tiling: resident weights vs. streamed weight slabs ------
    resident_w_bytes = (4 * hs * h1 + h1 * out_pad) * c_bytes
    if h1_tile is None:
        if 2 * resident_w_bytes <= vmem_ceiling // 2:
            h1_tile = h1                     # weights stay resident in VMEM
        else:
            per_col = 2 * (4 * hs + out_pad) * c_bytes   # double-buffered slab
            h1_tile = max(128, _round_down((vmem_ceiling // 2) // per_col, 128))
            h1_tile = min(h1_tile, _round_up(h1, 128))
    else:
        assert h1_tile == h1 or h1_tile % 128 == 0, \
            "h1_tile must equal h1 or be a multiple of 128"
    h1_pad = _round_up(h1, h1_tile)
    nj = h1_pad // h1_tile

    merged = (hs % 128 == 0)

    # ---- weight preprocessing (bf16, zero-padded) ----------------------------
    w1c = w1.astype(compute_dtype)
    if h1_pad != h1:
        w1c = jnp.pad(w1c, ((0, 0), (0, h1_pad - h1)))
    if merged:
        w1_blocks = (w1c[:2 * hs], w1c[2 * hs:])       # rows for [h|t], [|h-t| | h*t]
    else:
        w1_blocks = tuple(jnp.split(w1c, 4, axis=0))   # rows for h, t, |h-t|, h*t

    b1f = jnp.pad(b1.astype(jnp.float32).reshape(1, h1),
                  ((0, 0), (0, h1_pad - h1)))
    w2p = jnp.pad(w2.astype(compute_dtype),
                  ((0, h1_pad - h1), (0, out_pad - outdim)))
    b2f = jnp.pad(b2.astype(jnp.float32).reshape(1, outdim),
                  ((0, 0), (0, out_pad - outdim)))

    # ---- batch tile: as large as leftover VMEM allows, but >=2 grid steps ----
    if tile_n is None:
        weight_vmem = 2 * ((4 * hs + out_pad) * h1_tile * c_bytes
                           + (h1_tile + out_pad) * 4)
        per_row = (2 * 2 * hs * in_bytes           # h & t tiles, double-buffered
                   + 2 * out_pad * out_bytes       # output tile, double-buffered
                   + out_pad * 4                   # f32 accumulator scratch
                   + (2 * 2 * hs * c_bytes if merged else 0)   # x1/x2 scratch
                   + 4 * h1_tile * 4)              # z1 / relu live temporaries
        avail = max(vmem_ceiling - weight_vmem - (4 << 20), per_row * 8)
        tile_n = min(2048, avail // per_row, _round_up(N, 8))
        if N > 8:
            t4 = _round_up(pl.cdiv(N, 4), 8)
            t2 = _round_up(pl.cdiv(N, 2), 8)
            tile_n = min(tile_n, t4 if t4 >= 512 else t2)
        if tile_n >= 128:
            tile_n = _round_down(tile_n, 128)
        else:
            tile_n = max(8, _round_down(tile_n, 8))
    if N < tile_n:
        tile_n = N                                  # block == full (tiny) batch
    nb = pl.cdiv(N, tile_n)
    grid = (nb, nj)

    # ---- VMEM limit (actual footprint + headroom, capped at the ceiling) -----
    scratch_bytes = tile_n * out_pad * 4
    if merged:
        scratch_bytes += 2 * tile_n * 2 * hs * c_bytes
    vmem_needed = (2 * 2 * tile_n * hs * in_bytes
                   + 2 * tile_n * out_pad * out_bytes
                   + 2 * ((4 * hs + out_pad) * h1_tile * c_bytes
                          + (h1_tile + out_pad) * 4)
                   + scratch_bytes
                   + 4 * tile_n * h1_tile * 4)
    vmem_limit = int(min(vmem_ceiling, max(int(1.25 * vmem_needed), 16 << 20)))

    flops = 2 * N * (4 * hs) * h1 + 2 * N * h1 * out_pad
    weight_stream_bytes = (4 * hs + out_pad) * h1_pad * c_bytes
    bytes_accessed = (2 * N * hs * in_bytes
                      + N * out_pad * out_bytes
                      + (nb if nj > 1 else 1) * weight_stream_bytes
                      + (h1_pad + out_pad) * 4)

    def _call(single_buffer_weights):
        def wspec(shape, index_map):
            if single_buffer_weights:
                return pl.BlockSpec(shape, index_map,
                                    pipeline_mode=pl.Buffered(1))
            return pl.BlockSpec(shape, index_map)

        act_specs = [
            pl.BlockSpec((tile_n, hs), lambda i, j: (i, 0)),   # head tile
            pl.BlockSpec((tile_n, hs), lambda i, j: (i, 0)),   # tail tile
        ]
        if merged:
            w1_specs = [wspec((2 * hs, h1_tile), lambda i, j: (0, j))
                        for _ in range(2)]
        else:
            w1_specs = [wspec((hs, h1_tile), lambda i, j: (0, j))
                        for _ in range(4)]
        tail_specs = [
            wspec((1, h1_tile), lambda i, j: (0, j)),          # b1 (f32)
            wspec((h1_tile, out_pad), lambda i, j: (j, 0)),    # W2 (padded)
            wspec((1, out_pad), lambda i, j: (0, 0)),          # b2 (padded, f32)
        ]
        out_spec = pl.BlockSpec((tile_n, out_pad), lambda i, j: (i, 0))

        scratch = []
        if merged:
            scratch += [pltpu.VMEM((tile_n, 2 * hs), compute_dtype),
                        pltpu.VMEM((tile_n, 2 * hs), compute_dtype)]
        scratch += [pltpu.VMEM((tile_n, out_pad), jnp.float32)]

        kernel = (functools.partial(_mlp_kernel_merged, hs=hs) if merged
                  else _mlp_kernel_split4)

        return pl.pallas_call(
            kernel,
            out_shape=jax.ShapeDtypeStruct((N, out_pad), out_dtype),
            grid_spec=pltpu.PrefetchScalarGridSpec(
                num_scalar_prefetch=0,
                grid=grid,
                in_specs=act_specs + w1_specs + tail_specs,
                out_specs=out_spec,
                scratch_shapes=scratch),
            compiler_params=pltpu.CompilerParams(
                dimension_semantics=("parallel", "arbitrary"),
                vmem_limit_bytes=vmem_limit),
            cost_estimate=pl.CostEstimate(
                flops=int(flops), transcendentals=0,
                bytes_accessed=int(bytes_accessed)),
        )(head_rep, tail_rep, *w1_blocks, b1f, w2p, b2f)

    # Single-buffer the resident weights (constant index maps) only when the
    # h1 axis is not tiled; fall back to default double buffering if this jax
    # build does not support BlockSpec(pipeline_mode=...).
    try:
        out_padded = _call(single_buffer_weights=(nj == 1))
    except Exception:
        out_padded = _call(single_buffer_weights=False)

    return out_padded[:, :outdim]


# ---------------------------------------------------------------------------
# Reference + test
# ---------------------------------------------------------------------------

def init_params(key, indim, hs, outdim, dtype=jnp.float32):
    """nn.Linear-style init; weights stored transposed (in, out)."""
    k1, k2, k3, k4 = jax.random.split(key, 4)
    lim1 = 1.0 / (4 * indim) ** 0.5
    lim2 = 1.0 / (2 * hs) ** 0.5
    w1 = jax.random.uniform(k1, (4 * indim, 2 * hs), dtype, -lim1, lim1)
    b1 = jax.random.uniform(k2, (2 * hs,), dtype, -lim1, lim1)
    w2 = jax.random.uniform(k3, (2 * hs, outdim), dtype, -lim2, lim2)
    b2 = jax.random.uniform(k4, (outdim,), dtype, -lim2, lim2)
    return w1, b1, w2, b2


def mlp_reference(head_rep, tail_rep, w1, b1, w2, b2):
    x = jnp.concatenate(
        [head_rep, tail_rep, jnp.abs(head_rep - tail_rep), head_rep * tail_rep],
        axis=-1)
    z1 = jnp.maximum(x @ w1 + b1, 0.0)
    return z1 @ w2 + b2


if __name__ == "__main__":
    # Small shapes exercising every code path:
    #   (name, hs, outdim, N, forced h1_tile)
    cases = [
        ("split4 resident", 32, 16, 8, None),    # hs % 128 != 0, nj = 1
        ("merged resident", 128, 16, 64, None),  # hs % 128 == 0, nj = 1
        ("merged h1-tiled", 128, 16, 64, 128),   # merged path, nj = 2
        ("split4 h1-tiled", 192, 16, 40, 128),   # split path, nj = 3, ragged N
    ]

    for idx, (name, hs, outdim, N, h1_tile) in enumerate(cases):
        k = jax.random.fold_in(jax.random.PRNGKey(0), idx)
        kp, kh, kt = jax.random.split(k, 3)
        w1, b1, w2, b2 = init_params(kp, hs, hs, outdim)
        head_rep = jax.random.normal(kh, (N, hs), jnp.float32)
        tail_rep = jax.random.normal(kt, (N, hs), jnp.float32)

        out = mlp_forward(head_rep, tail_rep, w1, b1, w2, b2, h1_tile=h1_tile)
        out = jax.block_until_ready(out)

        ref = mlp_reference(head_rep, tail_rep, w1, b1, w2, b2)
        assert out.shape == (N, outdim), (name, out.shape)
        # bf16 MXU operands with f32 accumulation -> relaxed tolerance vs f32.
        assert jnp.allclose(out, ref, atol=5e-2, rtol=5e-2), (
            name, float(jnp.max(jnp.abs(out - ref))))

    print("KERNEL_OK")
</pallas_src>

<mosaic_0001>
module attributes {stable_mosaic.version = 11 : i64} {
  func.func @_mlp_kernel_split4(%arg0: i32, %arg1: i32, %arg2: memref<8x32xf32, #tpu.memory_space<vmem>>, %arg3: memref<8x32xf32, #tpu.memory_space<vmem>>, %arg4: memref<32x64xbf16, #tpu.memory_space<vmem>>, %arg5: memref<32x64xbf16, #tpu.memory_space<vmem>>, %arg6: memref<32x64xbf16, #tpu.memory_space<vmem>>, %arg7: memref<32x64xbf16, #tpu.memory_space<vmem>>, %arg8: memref<1x64xf32, #tpu.memory_space<vmem>>, %arg9: memref<64x128xbf16, #tpu.memory_space<vmem>>, %arg10: memref<1x128xf32, #tpu.memory_space<vmem>>, %arg11: memref<8x128xf32, #tpu.memory_space<vmem>>, %arg12: memref<8x128xf32, #tpu.memory_space<vmem>>) attributes {dimension_semantics = [#tpu.dimension_semantics<parallel>, #tpu.dimension_semantics<arbitrary>], iteration_bounds = array<i64: 1, 1>, scalar_prefetch = 0 : i64, scratch_operands = 1 : i64, tpu.core_type = #tpu.core_type<tc>, window_params = [{transform_indices = @transform_0, window_bounds = array<i64: 8, 32>}, {transform_indices = @transform_1, window_bounds = array<i64: 8, 32>}, {pipeline_mode = #tpu.pipeline_mode<synchronous>, transform_indices = @transform_2, window_bounds = array<i64: 32, 64>}, {pipeline_mode = #tpu.pipeline_mode<synchronous>, transform_indices = @transform_3, window_bounds = array<i64: 32, 64>}, {pipeline_mode = #tpu.pipeline_mode<synchronous>, transform_indices = @transform_4, window_bounds = array<i64: 32, 64>}, {pipeline_mode = #tpu.pipeline_mode<synchronous>, transform_indices = @transform_5, window_bounds = array<i64: 32, 64>}, {pipeline_mode = #tpu.pipeline_mode<synchronous>, transform_indices = @transform_6, window_bounds = array<i64: 1, 64>}, {pipeline_mode = #tpu.pipeline_mode<synchronous>, transform_indices = @transform_7, window_bounds = array<i64: 64, 128>}, {pipeline_mode = #tpu.pipeline_mode<synchronous>, transform_indices = @transform_8, window_bounds = array<i64: 1, 128>}, {transform_indices = @transform_9, window_bounds = array<i64: 8, 128>}]} {
    %c0 = arith.constant 0 : index
    %c0_0 = arith.constant 0 : index
    %0 = vector.load %arg2[%c0, %c0_0] : memref<8x32xf32, #tpu.memory_space<vmem>>, vector<8x32xf32>
    %c0_1 = arith.constant 0 : index
    %c0_2 = arith.constant 0 : index
    %1 = vector.load %arg3[%c0_1, %c0_2] : memref<8x32xf32, #tpu.memory_space<vmem>>, vector<8x32xf32>
    %2 = arith.subf %0, %1 : vector<8x32xf32>
    %3 = math.absf %2 : vector<8x32xf32>
    %4 = arith.mulf %0, %1 : vector<8x32xf32>
    %5 = arith.truncf %0 : vector<8x32xf32> to vector<8x32xbf16>
    %c0_3 = arith.constant 0 : index
    %c0_4 = arith.constant 0 : index
    %6 = vector.load %arg4[%c0_3, %c0_4] : memref<32x64xbf16, #tpu.memory_space<vmem>>, vector<32x64xbf16>
    %cst = arith.constant dense<0.000000e+00> : vector<8x64xf32>
    %7 = tpu.matmul %5, %6, %cst {dimension_numbers = #tpu.dot_dimension_numbers<[1], [0], [0], [1], [0, 0, 1, 1], [], []>} : vector<8x32xbf16>, vector<32x64xbf16>, vector<8x64xf32> -> vector<8x64xf32>
    %8 = arith.truncf %1 : vector<8x32xf32> to vector<8x32xbf16>
    %c0_5 = arith.constant 0 : index
    %c0_6 = arith.constant 0 : index
    %9 = vector.load %arg5[%c0_5, %c0_6] : memref<32x64xbf16, #tpu.memory_space<vmem>>, vector<32x64xbf16>
    %cst_7 = arith.constant dense<0.000000e+00> : vector<8x64xf32>
    %10 = tpu.matmul %8, %9, %cst_7 {dimension_numbers = #tpu.dot_dimension_numbers<[1], [0], [0], [1], [0, 0, 1, 1], [], []>} : vector<8x32xbf16>, vector<32x64xbf16>, vector<8x64xf32> -> vector<8x64xf32>
    %11 = arith.addf %7, %10 : vector<8x64xf32>
    %12 = arith.truncf %3 : vector<8x32xf32> to vector<8x32xbf16>
    %c0_8 = arith.constant 0 : index
    %c0_9 = arith.constant 0 : index
    %13 = vector.load %arg6[%c0_8, %c0_9] : memref<32x64xbf16, #tpu.memory_space<vmem>>, vector<32x64xbf16>
    %cst_10 = arith.constant dense<0.000000e+00> : vector<8x64xf32>
    %14 = tpu.matmul %12, %13, %cst_10 {dimension_numbers = #tpu.dot_dimension_numbers<[1], [0], [0], [1], [0, 0, 1, 1], [], []>} : vector<8x32xbf16>, vector<32x64xbf16>, vector<8x64xf32> -> vector<8x64xf32>
    %15 = arith.addf %11, %14 : vector<8x64xf32>
    %16 = arith.truncf %4 : vector<8x32xf32> to vector<8x32xbf16>
    %c0_11 = arith.constant 0 : index
    %c0_12 = arith.constant 0 : index
    %17 = vector.load %arg7[%c0_11, %c0_12] : memref<32x64xbf16, #tpu.memory_space<vmem>>, vector<32x64xbf16>
    %cst_13 = arith.constant dense<0.000000e+00> : vector<8x64xf32>
    %18 = tpu.matmul %16, %17, %cst_13 {dimension_numbers = #tpu.dot_dimension_numbers<[1], [0], [0], [1], [0, 0, 1, 1], [], []>} : vector<8x32xbf16>, vector<32x64xbf16>, vector<8x64xf32> -> vector<8x64xf32>
    %19 = arith.addf %15, %18 : vector<8x64xf32>
    %c0_14 = arith.constant 0 : index
    %c0_15 = arith.constant 0 : index
    %20 = vector.load %arg8[%c0_14, %c0_15] : memref<1x64xf32, #tpu.memory_space<vmem>>, vector<1x64xf32>
    %21 = vector.broadcast %20 : vector<1x64xf32> to vector<8x64xf32>
    %22 = arith.addf %19, %21 : vector<8x64xf32>
    %cst_16 = arith.constant 0.000000e+00 : f32
    %23 = vector.broadcast %cst_16 : f32 to vector<8x64xf32>
    %24 = arith.maximumf %22, %23 : vector<8x64xf32>
    %25 = arith.truncf %24 : vector<8x64xf32> to vector<8x64xbf16>
    %c0_17 = arith.constant 0 : index
    %c0_18 = arith.constant 0 : index
    %26 = vector.load %arg9[%c0_17, %c0_18] : memref<64x128xbf16, #tpu.memory_space<vmem>>, vector<64x128xbf16>
    %cst_19 = arith.constant dense<0.000000e+00> : vector<8x128xf32>
    %27 = tpu.matmul %25, %26, %cst_19 {dimension_numbers = #tpu.dot_dimension_numbers<[1], [0], [0], [1], [0, 0, 1, 1], [], []>} : vector<8x64xbf16>, vector<64x128xbf16>, vector<8x128xf32> -> vector<8x128xf32>
    %c0_i32 = arith.constant 0 : i32
    %28 = arith.cmpi eq, %arg1, %c0_i32 : i32
    %29 = arith.extui %28 : i1 to i32
    %c0_i32_20 = arith.constant 0 : i32
    %30 = arith.cmpi ne, %29, %c0_i32_20 : i32
    scf.if %30 {
      %cst_27 = arith.constant 0.000000e+00 : f32
      %37 = vector.broadcast %cst_27 : f32 to vector<8x128xf32>
      %c0_28 = arith.constant 0 : index
      %c0_29 = arith.constant 0 : index
      %38 = vector.load %arg12[%c0_28, %c0_29] : memref<8x128xf32, #tpu.memory_space<vmem>>, vector<8x128xf32>
      tpu.vector_store %arg12[%c0_28, %c0_29], %37 {strides = array<i32>} : memref<8x128xf32, #tpu.memory_space<vmem>>, vector<8x128xf32>,
    } else {
    }
    %c0_21 = arith.constant 0 : index
    %c0_22 = arith.constant 0 : index
    %31 = vector.load %arg12[%c0_21, %c0_22] : memref<8x128xf32, #tpu.memory_space<vmem>>, vector<8x128xf32>
    %32 = arith.addf %31, %27 : vector<8x128xf32>
    %c0_23 = arith.constant 0 : index
    %c0_24 = arith.constant 0 : index
    %33 = vector.load %arg12[%c0_23, %c0_24] : memref<8x128xf32, #tpu.memory_space<vmem>>, vector<8x128xf32>
    tpu.vector_store %arg12[%c0_23, %c0_24], %32 {strides = array<i32>} : memref<8x128xf32, #tpu.memory_space<vmem>>, vector<8x128xf32>,
    %c0_i32_25 = arith.constant 0 : i32
    %34 = arith.cmpi eq, %arg1, %c0_i32_25 : i32
    %35 = arith.extui %34 : i1 to i32
    %c0_i32_26 = arith.constant 0 : i32
    %36 = arith.cmpi ne, %35, %c0_i32_26 : i32
    scf.if %36 {
      %c0_27 = arith.constant 0 : index
      %c0_28 = arith.constant 0 : index
      %37 = vector.load %arg12[%c0_27, %c0_28] : memref<8x128xf32, #tpu.memory_space<vmem>>, vector<8x128xf32>
      %c0_29 = arith.constant 0 : index
      %c0_30 = arith.constant 0 : index
      %38 = vector.load %arg10[%c0_29, %c0_30] : memref<1x128xf32, #tpu.memory_space<vmem>>, vector<1x128xf32>
      %39 = vector.broadcast %38 : vector<1x128xf32> to vector<8x128xf32>
      %40 = arith.addf %37, %39 : vector<8x128xf32>
      %c0_31 = arith.constant 0 : index
      %c0_32 = arith.constant 0 : index
      %41 = vector.load %arg11[%c0_31, %c0_32] : memref<8x128xf32, #tpu.memory_space<vmem>>, vector<8x128xf32>
      tpu.vector_store %arg11[%c0_31, %c0_32], %40 {strides = array<i32>} : memref<8x128xf32, #tpu.memory_space<vmem>>, vector<8x128xf32>,
    } else {
    }
    return
  }
  func.func @transform_0(%arg0: i32, %arg1: i32) -> (i32, i32) {
    %c0_i32 = arith.constant 0 : i32
    %c0_i32_0 = arith.constant 0 : i32
    return %arg0, %c0_i32 : i32, i32
  }
  func.func @transform_1(%arg0: i32, %arg1: i32) -> (i32, i32) {
    %c0_i32 = arith.constant 0 : i32
    %c0_i32_0 = arith.constant 0 : i32
    return %arg0, %c0_i32 : i32, i32
  }
  func.func @transform_2(%arg0: i32, %arg1: i32) -> (i32, i32) {
    %c0_i32 = arith.constant 0 : i32
    %c0_i32_0 = arith.constant 0 : i32
    return %c0_i32, %arg1 : i32, i32
  }
  func.func @transform_3(%arg0: i32, %arg1: i32) -> (i32, i32) {
    %c0_i32 = arith.constant 0 : i32
    %c0_i32_0 = arith.constant 0 : i32
    return %c0_i32, %arg1 : i32, i32
  }
  func.func @transform_4(%arg0: i32, %arg1: i32) -> (i32, i32) {
    %c0_i32 = arith.constant 0 : i32
    %c0_i32_0 = arith.constant 0 : i32
    return %c0_i32, %arg1 : i32, i32
  }
  func.func @transform_5(%arg0: i32, %arg1: i32) -> (i32, i32) {
    %c0_i32 = arith.constant 0 : i32
    %c0_i32_0 = arith.constant 0 : i32
    return %c0_i32, %arg1 : i32, i32
  }
  func.func @transform_6(%arg0: i32, %arg1: i32) -> (i32, i32) {
    %c0_i32 = arith.constant 0 : i32
    %c0_i32_0 = arith.constant 0 : i32
    return %c0_i32, %arg1 : i32, i32
  }
  func.func @transform_7(%arg0: i32, %arg1: i32) -> (i32, i32) {
    %c0_i32 = arith.constant 0 : i32
    %c0_i32_0 = arith.constant 0 : i32
    return %arg1, %c0_i32 : i32, i32
  }
  func.func @transform_8(%arg0: i32, %arg1: i32) -> (i32, i32) {
    %c0_i32 = arith.constant 0 : i32
    %c0_i32_0 = arith.constant 0 : i32
    %c0_i32_1 = arith.constant 0 : i32
    return %c0_i32, %c0_i32_0 : i32, i32
  }
  func.func @transform_9(%arg0: i32, %arg1: i32) -> (i32, i32) {
    %c0_i32 = arith.constant 0 : i32
    %c0_i32_0 = arith.constant 0 : i32
    return %arg0, %c0_i32 : i32, i32
  }
}

module attributes {stable_mosaic.version = 11 : i64} {
  func.func @_mlp_kernel_split4(%arg0: i32, %arg1: i32, %arg2: memref<8x32xf32, #tpu.memory_space<vmem>>, %arg3: memref<8x32xf32, #tpu.memory_space<vmem>>, %arg4: memref<32x64xbf16, #tpu.memory_space<vmem>>, %arg5: memref<32x64xbf16, #tpu.memory_space<vmem>>, %arg6: memref<32x64xbf16, #tpu.memory_space<vmem>>, %arg7: memref<32x64xbf16, #tpu.memory_space<vmem>>, %arg8: memref<1x64xf32, #tpu.memory_space<vmem>>, %arg9: memref<64x128xbf16, #tpu.memory_space<vmem>>, %arg10: memref<1x128xf32, #tpu.memory_space<vmem>>, %arg11: memref<8x128xf32, #tpu.memory_space<vmem>>, %arg12: memref<8x128xf32, #tpu.memory_space<vmem>>) attributes {dimension_semantics = [#tpu.dimension_semantics<parallel>, #tpu.dimension_semantics<arbitrary>], iteration_bounds = array<i64: 1, 1>, scalar_prefetch = 0 : i64, scratch_operands = 1 : i64, tpu.core_type = #tpu.core_type<tc>, window_params = [{transform_indices = @transform_0, window_bounds = array<i64: 8, 32>}, {transform_indices = @transform_1, window_bounds = array<i64: 8, 32>}, {transform_indices = @transform_2, window_bounds = array<i64: 32, 64>}, {transform_indices = @transform_3, window_bounds = array<i64: 32, 64>}, {transform_indices = @transform_4, window_bounds = array<i64: 32, 64>}, {transform_indices = @transform_5, window_bounds = array<i64: 32, 64>}, {transform_indices = @transform_6, window_bounds = array<i64: 1, 64>}, {transform_indices = @transform_7, window_bounds = array<i64: 64, 128>}, {pipeline_mode = #tpu.pipeline_mode<synchronous>, transform_indices = @transform_8, window_bounds = array<i64: 1, 128>}, {transform_indices = @transform_9, window_bounds = array<i64: 8, 128>}]} {
    %c0 = arith.constant 0 : index
    %c0_0 = arith.constant 0 : index
    %0 = vector.load %arg2[%c0, %c0_0] : memref<8x32xf32, #tpu.memory_space<vmem>>, vector<8x32xf32>
    %c0_1 = arith.constant 0 : index
    %c0_2 = arith.constant 0 : index
    %1 = vector.load %arg3[%c0_1, %c0_2] : memref<8x32xf32, #tpu.memory_space<vmem>>, vector<8x32xf32>
    %2 = arith.subf %0, %1 : vector<8x32xf32>
    %3 = math.absf %2 : vector<8x32xf32>
    %4 = arith.mulf %0, %1 : vector<8x32xf32>
    %5 = arith.truncf %0 : vector<8x32xf32> to vector<8x32xbf16>
    %c0_3 = arith.constant 0 : index
    %c0_4 = arith.constant 0 : index
    %6 = vector.load %arg4[%c0_3, %c0_4] : memref<32x64xbf16, #tpu.memory_space<vmem>>, vector<32x64xbf16>
    %cst = arith.constant dense<0.000000e+00> : vector<8x64xf32>
    %7 = tpu.matmul %5, %6, %cst {dimension_numbers = #tpu.dot_dimension_numbers<[1], [0], [0], [1], [0, 0, 1, 1], [], []>} : vector<8x32xbf16>, vector<32x64xbf16>, vector<8x64xf32> -> vector<8x64xf32>
    %8 = arith.truncf %1 : vector<8x32xf32> to vector<8x32xbf16>
    %c0_5 = arith.constant 0 : index
    %c0_6 = arith.constant 0 : index
    %9 = vector.load %arg5[%c0_5, %c0_6] : memref<32x64xbf16, #tpu.memory_space<vmem>>, vector<32x64xbf16>
    %cst_7 = arith.constant dense<0.000000e+00> : vector<8x64xf32>
    %10 = tpu.matmul %8, %9, %cst_7 {dimension_numbers = #tpu.dot_dimension_numbers<[1], [0], [0], [1], [0, 0, 1, 1], [], []>} : vector<8x32xbf16>, vector<32x64xbf16>, vector<8x64xf32> -> vector<8x64xf32>
    %11 = arith.addf %7, %10 : vector<8x64xf32>
    %12 = arith.truncf %3 : vector<8x32xf32> to vector<8x32xbf16>
    %c0_8 = arith.constant 0 : index
    %c0_9 = arith.constant 0 : index
    %13 = vector.load %arg6[%c0_8, %c0_9] : memref<32x64xbf16, #tpu.memory_space<vmem>>, vector<32x64xbf16>
    %cst_10 = arith.constant dense<0.000000e+00> : vector<8x64xf32>
    %14 = tpu.matmul %12, %13, %cst_10 {dimension_numbers = #tpu.dot_dimension_numbers<[1], [0], [0], [1], [0, 0, 1, 1], [], []>} : vector<8x32xbf16>, vector<32x64xbf16>, vector<8x64xf32> -> vector<8x64xf32>
    %15 = arith.addf %11, %14 : vector<8x64xf32>
    %16 = arith.truncf %4 : vector<8x32xf32> to vector<8x32xbf16>
    %c0_11 = arith.constant 0 : index
    %c0_12 = arith.constant 0 : index
    %17 = vector.load %arg7[%c0_11, %c0_12] : memref<32x64xbf16, #tpu.memory_space<vmem>>, vector<32x64xbf16>
    %cst_13 = arith.constant dense<0.000000e+00> : vector<8x64xf32>
    %18 = tpu.matmul %16, %17, %cst_13 {dimension_numbers = #tpu.dot_dimension_numbers<[1], [0], [0], [1], [0, 0, 1, 1], [], []>} : vector<8x32xbf16>, vector<32x64xbf16>, vector<8x64xf32> -> vector<8x64xf32>
    %19 = arith.addf %15, %18 : vector<8x64xf32>
    %c0_14 = arith.constant 0 : index
    %c0_15 = arith.constant 0 : index
    %20 = vector.load %arg8[%c0_14, %c0_15] : memref<1x64xf32, #tpu.memory_space<vmem>>, vector<1x64xf32>
    %21 = vector.broadcast %20 : vector<1x64xf32> to vector<8x64xf32>
    %22 = arith.addf %19, %21 : vector<8x64xf32>
    %cst_16 = arith.constant 0.000000e+00 : f32
    %23 = vector.broadcast %cst_16 : f32 to vector<8x64xf32>
    %24 = arith.maximumf %22, %23 : vector<8x64xf32>
    %25 = arith.truncf %24 : vector<8x64xf32> to vector<8x64xbf16>
    %c0_17 = arith.constant 0 : index
    %c0_18 = arith.constant 0 : index
    %26 = vector.load %arg9[%c0_17, %c0_18] : memref<64x128xbf16, #tpu.memory_space<vmem>>, vector<64x128xbf16>
    %cst_19 = arith.constant dense<0.000000e+00> : vector<8x128xf32>
    %27 = tpu.matmul %25, %26, %cst_19 {dimension_numbers = #tpu.dot_dimension_numbers<[1], [0], [0], [1], [0, 0, 1, 1], [], []>} : vector<8x64xbf16>, vector<64x128xbf16>, vector<8x128xf32> -> vector<8x128xf32>
    %c0_i32 = arith.constant 0 : i32
    %28 = arith.cmpi eq, %arg1, %c0_i32 : i32
    %29 = arith.extui %28 : i1 to i32
    %c0_i32_20 = arith.constant 0 : i32
    %30 = arith.cmpi ne, %29, %c0_i32_20 : i32
    scf.if %30 {
      %cst_27 = arith.constant 0.000000e+00 : f32
      %37 = vector.broadcast %cst_27 : f32 to vector<8x128xf32>
      %c0_28 = arith.constant 0 : index
      %c0_29 = arith.constant 0 : index
      %38 = vector.load %arg12[%c0_28, %c0_29] : memref<8x128xf32, #tpu.memory_space<vmem>>, vector<8x128xf32>
      tpu.vector_store %arg12[%c0_28, %c0_29], %37 {strides = array<i32>} : memref<8x128xf32, #tpu.memory_space<vmem>>, vector<8x128xf32>,
    } else {
    }
    %c0_21 = arith.constant 0 : index
    %c0_22 = arith.constant 0 : index
    %31 = vector.load %arg12[%c0_21, %c0_22] : memref<8x128xf32, #tpu.memory_space<vmem>>, vector<8x128xf32>
    %32 = arith.addf %31, %27 : vector<8x128xf32>
    %c0_23 = arith.constant 0 : index
    %c0_24 = arith.constant 0 : index
    %33 = vector.load %arg12[%c0_23, %c0_24] : memref<8x128xf32, #tpu.memory_space<vmem>>, vector<8x128xf32>
    tpu.vector_store %arg12[%c0_23, %c0_24], %32 {strides = array<i32>} : memref<8x128xf32, #tpu.memory_space<vmem>>, vector<8x128xf32>,
    %c0_i32_25 = arith.constant 0 : i32
    %34 = arith.cmpi eq, %arg1, %c0_i32_25 : i32
    %35 = arith.extui %34 : i1 to i32
    %c0_i32_26 = arith.constant 0 : i32
    %36 = arith.cmpi ne, %35, %c0_i32_26 : i32
    scf.if %36 {
      %c0_27 = arith.constant 0 : index
      %c0_28 = arith.constant 0 : index
      %37 = vector.load %arg12[%c0_27, %c0_28] : memref<8x128xf32, #tpu.memory_space<vmem>>, vector<8x128xf32>
      %c0_29 = arith.constant 0 : index
      %c0_30 = arith.constant 0 : index
      %38 = vector.load %arg10[%c0_29, %c0_30] : memref<1x128xf32, #tpu.memory_space<vmem>>, vector<1x128xf32>
      %39 = vector.broadcast %38 : vector<1x128xf32> to vector<8x128xf32>
      %40 = arith.addf %37, %39 : vector<8x128xf32>
      %c0_31 = arith.constant 0 : index
      %c0_32 = arith.constant 0 : index
      %41 = vector.load %arg11[%c0_31, %c0_32] : memref<8x128xf32, #tpu.memory_space<vmem>>, vector<8x128xf32>
      tpu.vector_store %arg11[%c0_31, %c0_32], %40 {strides = array<i32>} : memref<8x128xf32, #tpu.memory_space<vmem>>, vector<8x128xf32>,
    } else {
    }
    return
  }
  func.func @transform_0(%arg0: i32, %arg1: i32) -> (i32, i32) {
    %c0_i32 = arith.constant 0 : i32
    %c0_i32_0 = arith.constant 0 : i32
    return %arg0, %c0_i32 : i32, i32
  }
  func.func @transform_1(%arg0: i32, %arg1: i32) -> (i32, i32) {
    %c0_i32 = arith.constant 0 : i32
    %c0_i32_0 = arith.constant 0 : i32
    return %arg0, %c0_i32 : i32, i32
  }
  func.func @transform_2(%arg0: i32, %arg1: i32) -> (i32, i32) {
    %c0_i32 = arith.constant 0 : i32
    %c0_i32_0 = arith.constant 0 : i32
    return %c0_i32, %arg1 : i32, i32
  }
  func.func @transform_3(%arg0: i32, %arg1: i32) -> (i32, i32) {
    %c0_i32 = arith.constant 0 : i32
    %c0_i32_0 = arith.constant 0 : i32
    return %c0_i32, %arg1 : i32, i32
  }
  func.func @transform_4(%arg0: i32, %arg1: i32) -> (i32, i32) {
    %c0_i32 = arith.constant 0 : i32
    %c0_i32_0 = arith.constant 0 : i32
    return %c0_i32, %arg1 : i32, i32
  }
  func.func @transform_5(%arg0: i32, %arg1: i32) -> (i32, i32) {
    %c0_i32 = arith.constant 0 : i32
    %c0_i32_0 = arith.constant 0 : i32
    return %c0_i32, %arg1 : i32, i32
  }
  func.func @transform_6(%arg0: i32, %arg1: i32) -> (i32, i32) {
    %c0_i32 = arith.constant 0 : i32
    %c0_i32_0 = arith.constant 0 : i32
    return %c0_i32, %arg1 : i32, i32
  }
  func.func @transform_7(%arg0: i32, %arg1: i32) -> (i32, i32) {
    %c0_i32 = arith.constant 0 : i32
    %c0_i32_0 = arith.constant 0 : i32
    return %arg1, %c0_i32 : i32, i32
  }
  func.func @transform_8(%arg0: i32, %arg1: i32) -> (i32, i32) {
    %c0_i32 = arith.constant 0 : i32
    %c0_i32_0 = arith.constant 0 : i32
    %c0_i32_1 = arith.constant 0 : i32
    return %c0_i32, %c0_i32_0 : i32, i32
  }
  func.func @transform_9(%arg0: i32, %arg1: i32) -> (i32, i32) {
    %c0_i32 = arith.constant 0 : i32
    %c0_i32_0 = arith.constant 0 : i32
    return %arg0, %c0_i32 : i32, i32
  }
}

</mosaic_0001>

<bundles_post_ra>
// kernel: tpu_custom_call.1
= control target key start
LH: loop header
LB: loop body
LE: loop exit
PB: predicated region body
PF: predicated region fallthrough
CT: control target
= control target key end

     0   :  { %14 = vsyncpa [#allocation4], 0  ;;  %s930_s0 = inlined_call_operand.hbm [shape: f32[8,32], index: 0, kind: input, shape index: {}]   ;;  %s931_s1 = inlined_call_operand.hbm [shape: f32[8,32], index: 1, kind: input, shape index: {}]   ;;  %s932_s2 = inlined_call_operand.hbm [shape: bf16[32,64], index: 2, kind: input, shape index: {}]   ;;  %s933_s3 = inlined_call_operand.hbm [shape: bf16[32,64], index: 3, kind: input, shape index: {}]   ;;  %s934_s4 = inlined_call_operand.hbm [shape: bf16[32,64], index: 4, kind: input, shape index: {}]   ;;  %s935_s5 = inlined_call_operand.vmem [shape: bf16[32,64], index: 5, kind: input, shape index: {}]   ;;  %s936_s6 = inlined_call_operand.vmem [shape: f32[1,64], index: 6, kind: input, shape index: {}]   ;;  %s937_s7 = inlined_call_operand.hbm [shape: bf16[64,128], index: 7, kind: input, shape index: {}]   ;;  %s938_s8 = inlined_call_operand.vmem [shape: f32[1,128], index: 8, kind: input, shape index: {}]   ;;  %s939_s9 = inlined_call_operand.hbm [shape: f32[8,128], index: 9, kind: output, shape index: {}]  }
   0x1   :  { %15 = vsyncpa [#allocation7], 0 }
   0x2   :  { %16 = vsyncpa [#allocation10], 0 }
   0x3   :  { %17 = vsyncpa [#allocation13], 0 }
   0x4   :  { %18 = vsyncpa [#allocation5], 0  ;;  %s752_s30 = smov [#allocation6]   ;;  %s588_s13 = scalar_lea.hbm %s931_s1, 128 }
   0x5   :  { %s35_s10 = sshll.u32 %s752_s30, 4  ;;  %p589_p0 = scmp.ne.s32.totalorder %s931_s1, %s588_s13  ;;  %s36_s10 = int_to_ptr.vmem [resolvable:$true] %s35_s10 }
   0x6   :  { %p592_p1 = scmp.lt.u32.totalorder %s588_s13, %s931_s1 }
   0x8   :  { %p594_p2 = pnand %p592_p1, %p589_p0 }
   0xa   :  { %597 = shalt.err (!%p594_p2)
}
   0xb   :  { %s598_s18 = scalar_lea.vmem %s36_s10, 128  ;;  %p603_p4 = scmp.lt.s32.totalorder %s36_s10, %s36_s10 }
   0xc   :  { %p599_p3 = scmp.ne.s32.totalorder %s36_s10, %s598_s18  ;;  %p604_p5 = scmp.lt.s32.totalorder %s598_s18, %s598_s18 }
   0xe   :  { %p605_p6 = por %p604_p5, %p603_p4 }
  0x10   :  { %p606_p7 = pnand %p605_p6, %p599_p3 }
  0x12   :  { %609 = shalt.err (!%p606_p7)
}
  0x13   :  { %38 = dma.hbm_to_vmem [thread:$0]  %s931_s1, 128, %s36_s10, [#allocation7]  }
  0x14   :  { %s753_s21 = smov [#allocation9]   ;;  %s754_s23 = smov [#allocation3]  }
  0x15   :  { %s56_s22 = sshll.u32 %s753_s21, 4  ;;  %s25_s24 = sshll.u32 %s754_s23, 4  ;;  %s57_s22 = int_to_ptr.vmem [resolvable:$true] %s56_s22  ;;  %s26_s24 = int_to_ptr.vmem [resolvable:$true] %s25_s24 }
  0x16   :  { %s610_s27 = scalar_lea.hbm %s933_s3, 256 }
  0x17   :  { %p611_p8 = scmp.ne.s32.totalorder %s933_s3, %s610_s27  ;;  %p614_p9 = scmp.lt.u32.totalorder %s610_s27, %s933_s3 }
  0x19   :  { %p616_p10 = pnand %p614_p9, %p611_p8 }
  0x1b   :  { %619 = shalt.err (!%p616_p10)
}
  0x1c   :  { %s620_s1 = scalar_lea.vmem %s57_s22, 256  ;;  %p625_p12 = scmp.lt.s32.totalorder %s57_s22, %s57_s22 }
  0x1d   :  { %p621_p11 = scmp.ne.s32.totalorder %s57_s22, %s620_s1  ;;  %p626_p13 = scmp.lt.s32.totalorder %s620_s1, %s620_s1 }
  0x1f   :  { %p627_p0 = por %p626_p13, %p625_p12 }
  0x21   :  { %p628_p1 = pnand %p627_p0, %p621_p11 }
  0x23   :  { %631 = shalt.err (!%p628_p1)
}
  0x24   :  { %s755_s10 = smov 64   ;;  %s756_s12 = smov 4  }
  0x25   :  { %62 = dma.hbm_to_vmem [thread:$0]  %s933_s3, 256, %s57_s22, [#allocation10], %s755_s10, %s755_s10, %s756_s12  }
  0x26   :  { %s632_s17 = scalar_lea.hbm %s930_s0, 128 }
  0x27   :  { %p633_p2 = scmp.ne.s32.totalorder %s930_s0, %s632_s17  ;;  %p636_p3 = scmp.lt.u32.totalorder %s632_s17, %s930_s0 }
  0x29   :  { %p638_p4 = pnand %p636_p3, %p633_p2 }
  0x2b   :  { %641 = shalt.err (!%p638_p4)
}
  0x2c   :  { %s642_s23 = scalar_lea.vmem %s26_s24, 128  ;;  %p647_p6 = scmp.lt.s32.totalorder %s26_s24, %s26_s24 }
  0x2d   :  { %p643_p5 = scmp.ne.s32.totalorder %s26_s24, %s642_s23  ;;  %p648_p7 = scmp.lt.s32.totalorder %s642_s23, %s642_s23 }
  0x2f   :  { %p649_p8 = por %p648_p7, %p647_p6 }
  0x31   :  { %p650_p9 = pnand %p649_p8, %p643_p5 }
  0x33   :  { %653 = shalt.err (!%p650_p9)
}
  0x34   :  { %28 = dma.hbm_to_vmem [thread:$0]  %s930_s0, 128, %s26_s24, [#allocation4]  }
  0x35   :  { %s757_s25 = smov [#allocation8]   ;;  %s758_s27 = smov [#allocation11]  }
  0x36   :  { %s44_s26 = sshll.u32 %s757_s25, 4  ;;  %s68_s28 = sshll.u32 %s758_s27, 4  ;;  %s45_s26 = int_to_ptr.vmem [resolvable:$true] %s44_s26  ;;  %s69_s28 = int_to_ptr.vmem [resolvable:$true] %s68_s28 }
  0x37   :  { %s654_s11 = scalar_lea.hbm %s932_s2, 256 }
  0x38   :  { %p655_p10 = scmp.ne.s32.totalorder %s932_s2, %s654_s11  ;;  %p658_p11 = scmp.lt.u32.totalorder %s654_s11, %s932_s2 }
  0x3a   :  { %p660_p12 = pnand %p658_p11, %p655_p10 }
  0x3c   :  { %663 = shalt.err (!%p660_p12)
}
  0x3d   :  { %s664_s0 = scalar_lea.vmem %s45_s26, 256  ;;  %p669_p0 = scmp.lt.s32.totalorder %s45_s26, %s45_s26 }
  0x3e   :  { %p665_p13 = scmp.ne.s32.totalorder %s45_s26, %s664_s0  ;;  %p670_p1 = scmp.lt.s32.totalorder %s664_s0, %s664_s0 }
  0x40   :  { %p671_p2 = por %p670_p1, %p669_p0 }
  0x42   :  { %p672_p3 = pnand %p671_p2, %p665_p13 }
  0x44   :  { %675 = shalt.err (!%p672_p3)
}
  0x45   :  { %50 = dma.hbm_to_vmem [thread:$0]  %s932_s2, 256, %s45_s26, [#allocation7], %s755_s10, %s755_s10, %s756_s12  }
  0x46   :  { %s676_s19 = scalar_lea.hbm %s934_s4, 256 }
  0x47   :  { %p677_p4 = scmp.ne.s32.totalorder %s934_s4, %s676_s19  ;;  %p680_p5 = scmp.lt.u32.totalorder %s676_s19, %s934_s4 }
  0x49   :  { %p682_p6 = pnand %p680_p5, %p677_p4 }
  0x4b   :  { %685 = shalt.err (!%p682_p6)
}
  0x4c   :  { %s686_s22 = scalar_lea.vmem %s69_s28, 256  ;;  %p691_p8 = scmp.lt.s32.totalorder %s69_s28, %s69_s28 }
  0x4d   :  { %p687_p7 = scmp.ne.s32.totalorder %s69_s28, %s686_s22  ;;  %p692_p9 = scmp.lt.s32.totalorder %s686_s22, %s686_s22 }
  0x4f   :  { %p693_p10 = por %p692_p9, %p691_p8 }
  0x51   :  { %p694_p11 = pnand %p693_p10, %p687_p7 }
  0x53   :  { %697 = shalt.err (!%p694_p11)
}
  0x54   :  { %74 = dma.hbm_to_vmem [thread:$0]  %s934_s4, 256, %s69_s28, [#allocation10], %s755_s10, %s755_s10, %s756_s12  }
  0x55   :  { %s759_s26 = smov [#allocation12]   ;;  %s698_s11 = scalar_lea.hbm %s937_s7, 512 }
  0x56   :  { %s84_s27 = sshll.u32 %s759_s26, 4  ;;  %p699_p12 = scmp.ne.s32.totalorder %s937_s7, %s698_s11  ;;  %s85_s27 = int_to_ptr.vmem [resolvable:$true] %s84_s27 }
  0x57   :  { %p702_p13 = scmp.lt.u32.totalorder %s698_s11, %s937_s7 }
  0x59   :  { %p704_p0 = pnand %p702_p13, %p699_p12 }
  0x5b   :  { %707 = shalt.err (!%p704_p0)
}
  0x5c   :  { %s708_s0 = scalar_lea.vmem %s85_s27, 512  ;;  %p713_p2 = scmp.lt.s32.totalorder %s85_s27, %s85_s27 }
  0x5d   :  { %p709_p1 = scmp.ne.s32.totalorder %s85_s27, %s708_s0  ;;  %p714_p3 = scmp.lt.s32.totalorder %s708_s0, %s708_s0 }
  0x5f   :  { %p715_p4 = por %p714_p3, %p713_p2 }
  0x61   :  { %p716_p5 = pnand %p715_p4, %p709_p1 }
  0x63   :  { %719 = shalt.err (!%p716_p5)
}
  0x64   :  { %90 = dma.hbm_to_vmem [thread:$0]  %s937_s7, 512, %s85_s27, [#allocation13], %s755_s10, %s755_s10, %s756_s12  }
  0x65   :  { %742 = dma.done.wait [#allocation4], 128  }
  0x66   :  { %743 = vsyncadd [#allocation4], 4294967168 }
  0x67   :  { %744 = dma.done.wait [#allocation7], 384  }
  0x68   :  { %745 = vsyncadd [#allocation7], 4294966912 }
  0x69   :  { %746 = dma.done.wait [#allocation10], 512  }
  0x6a   :  { %747 = vsyncadd [#allocation10], 4294966784 }
  0x6b   :  { %748 = dma.done.wait [#allocation13], 512  }
  0x6c   :  { %749 = vsyncadd [#allocation13], 4294966784  ;;  %v760_v0 = vmov 0.0   ;;  %vm761_vm0 = vmmov 0   ;;  %v576_v1 = vld [vmem:[#allocation9] sm:$0xff]   ;;  %v577_v2 = vld [vmem:[#allocation9 + $0x8] sm:$0xff]  }
  0x6d   :  { %521 = vmatprep.subr.bf16.mxu1 %v760_v0  ;;  %525 = vmatprep.mubr.msk.bf16.mxu1 %vm761_vm0, %v760_v0  ;;  %v112_v3 = vld [vmem:[#allocation3] sm:$0xff]  ;;  %v113_v4 = vld [vmem:[#allocation6] sm:$0xff]  ;;  %v579_v6 = vld [vmem:[#allocation11] sm:$0xff]   ;;  %vm139_vm1 = vcmask 261120   ;;  %vm402_vm2 = vcmask 523264   ;;  %s762_s19 = smov [#allocation14]  }
  0x6e   :  { %537 = vmatprep.subr.bf16.mxu0 %v760_v0  ;;  %541 = vmatprep.mubr.msk.bf16.mxu0 %vm761_vm0, %v760_v0  ;;  %v114_v5 = vsub.f32 %v112_v3, %v113_v4  ;;  %v122_v7 = vpack.c.bf16 %v113_v4, %v113_v4  ;;  %v578_v8 = vld [vmem:[#allocation8] sm:$0xff]   ;;  %v581_v9 = vld [vmem:[#allocation11 + $0x8] sm:$0xff]   ;;  %v117_v13 = vpack.c.bf16 %v112_v3, %v112_v3  ;;  %v584_v18 = vld [vmem:[#allocation12] sm:$0xff]   ;;  %s473_s20 = sshll.u32 %s762_s19, 4  ;;  %s474_s20 = int_to_ptr.vmem [resolvable:$true] %s473_s20 }
  0x6f   :  { %522 = vmatpush3.bf16.msra.mxu1 %v576_v1  ;;  %538 = vmatpush3.bf16.msra.mxu0 %v579_v6  ;;  %v580_v11 = vld [vmem:[#allocation8 + $0x8] sm:$0xff]   ;;  %v582_v14 = vld [vmem:[%s935_s5] sm:$0xff]   ;;  %v116_v15 = vmul.f32 %v113_v4, %v112_v3  ;;  %v585_v19 = vld [vmem:[#allocation12 + $0x8] sm:$0xff]   ;;  %p725_p7 = scmp.lt.s32.totalorder %s474_s20, %s474_s20 }
  0x70   :  { %523 = vmatprep.subr.bf16.mxu1 %v760_v0  ;;  %539 = vmatprep.subr.bf16.mxu0 %v760_v0  ;;  %v115_v10 = vand.u32 2147483647, %v114_v5  ;;  %v583_v16 = vld [vmem:[%s935_s5 + $0x8] sm:$0xff]   ;;  %v586_v20 = vld [vmem:[#allocation12 + $0x10] sm:$0xff]  }
  0x71   :  { %v299_v17 = vpack.c.bf16 %v116_v15, %v116_v15  ;;  %v587_v21 = vld [vmem:[#allocation12 + $0x18] sm:$0xff]   ;;  %v497_v37 = vld [vmem:[%s936_s6] ss:$0 sm:$0xff]  ;;  %s720_s6 = scalar_lea.vmem %s474_s20, 128 }
  0x72   :  { %v238_v12 = vpack.c.bf16 %v115_v10, %v115_v10  ;;  %v503_v45 = vld [vmem:[%s938_s8] ss:$0 sm:$0xff]  ;;  %p721_p6 = scmp.ne.s32.totalorder %s474_s20, %s720_s6  ;;  %p726_p8 = scmp.lt.s32.totalorder %s720_s6, %s720_s6 }
  0x73   :  { %524 = vmatpush3.bf16.msra.mxu1 %v577_v2  ;;  %540 = vmatpush3.bf16.msra.mxu0 %v581_v9 }
  0x74   :  { %529 = vmatprep.subr.bf16.mxu1 %v760_v0  ;;  %553 = vmatprep.subr.bf16.mxu0 %v760_v0  ;;  %p727_p9 = por %p726_p8, %p725_p7 }
  0x76   :  { %526 = vmatmul.mubr.msk.bf16.vlgmr.msra.gmra.mrb[0].mxu1 %vm139_vm1, %v122_v7  ;;  %542 = vmatmul.mubr.msk.bf16.vlgmr.msra.gmra.mrb[0].mxu0 %vm139_vm1, %v238_v12  ;;  %p728_p10 = pnand %p727_p9, %p721_p6 }
  0x77   :  { %530 = vmatpush3.bf16.msra.mxu1 %v578_v8  ;;  %533 = vmatprep.mubr.msk.bf16.mxu1 %vm761_vm0, %v760_v0 }
  0x78   :  { %531 = vmatprep.subr.bf16.mxu1 %v760_v0  ;;  %561 = vmatprep.mubr.msk.bf16.mxu0 %vm761_vm0, %v760_v0 }
  0x79   :  { %554 = vmatpush3.bf16.msra.mxu0 %v584_v18 }
  0x7a   :  { %555 = vmatprep.subr.bf16.mxu0 %v760_v0 }
  0x7b   :  { %532 = vmatpush3.bf16.msra.mxu1 %v580_v11 }
  0x7c   :  { %545 = vmatprep.subr.bf16.mxu1 %v760_v0 }
  0x7d   :  { %556 = vmatpush3.bf16.msra.mxu0 %v585_v19 }
  0x7e   :  { %534 = vmatmul.mubr.msk.bf16.vlgmr.msra.gmra.mrb[4].mxu1 %vm139_vm1, %v117_v13  ;;  %557 = vmatprep.subr.bf16.mxu0 %v760_v0 }
  0x7f   :  { %546 = vmatpush3.bf16.msra.mxu1 %v582_v14  ;;  %549 = vmatprep.mubr.msk.bf16.mxu1 %vm761_vm0, %v760_v0 }
  0x80   :  { %547 = vmatprep.subr.bf16.mxu1 %v760_v0 }
  0x81   :  { %558 = vmatpush3.bf16.msra.mxu0 %v586_v20 }
  0x82   :  { %559 = vmatprep.subr.bf16.mxu0 %v760_v0 }
  0x83   :  { %548 = vmatpush3.bf16.msra.mxu1 %v583_v16 }
  0x85   :  { %560 = vmatpush3.bf16.msra.mxu0 %v587_v21 }
  0x86   :  { %550 = vmatmul.mubr.msk.bf16.vlgmr.msra.gmra.mrb[8].mxu1 %vm139_vm1, %v299_v17 }
 0x149   :  { %v177_v22 = vpop.f32.mrb[0].mxu1  ;;  %v292_v26 = vpop.f32.mrb[0].mxu0 }
 0x14a   :  { %v527_v23 = vpop.f32.mrb[1].mxu1  ;;  %v543_v27 = vpop.f32.mrb[1].mxu0 }
 0x14b   :  { %v180_v24 = vpop.f32.mrb[2].mxu1  ;;  %v295_v28 = vpop.f32.mrb[2].mxu0 }
 0x14c   :  { %v528_v25 = vpop.f32.mrb[3].mxu1  ;;  %v544_v30 = vpop.f32.mrb[3].mxu0 }
 0x151   :  { %v232_v29 = vpop.f32.mrb[4].mxu1 }
 0x152   :  { %v233_v31 = vadd.f32 %v232_v29, %v177_v22  ;;  %v535_v32 = vpop.f32.mrb[5].mxu1 }
 0x153   :  { %v235_v33 = vpop.f32.mrb[6].mxu1 }
 0x154   :  { %v298_v34 = vadd.f32 %v292_v26, %v233_v31  ;;  %v536_v35 = vpop.f32.mrb[7].mxu1 }
 0x159   :  { %v353_v36 = vpop.f32.mrb[8].mxu1 }
 0x15a   :  { %v359_v38 = vadd.f32 %v353_v36, %v298_v34  ;;  %v551_v39 = vpop.f32.mrb[9].mxu1 }
 0x15b   :  { %v356_v40 = vpop.f32.mrb[10].mxu1 }
 0x15c   :  { %v367_v41 = vadd.f32 %v497_v37, %v359_v38  ;;  %v552_v42 = vpop.f32.mrb[11].mxu1 }
 0x15e   :  { %v368_v43 = vmax.f32 %v367_v41, 0.0 }
 0x160   :  { %v369_v44 = vpack.c.bf16 %v368_v43, %v368_v43 }
 0x162   :  { %562 = vmatmul.mubr.msk.bf16.vlgmr.msra.gmra.mrb[4].mxu0 %vm402_vm2, %v369_v44 }
 0x235   :  { %v440_v46 = vpop.f32.mrb[4].mxu0 }
 0x236   :  { %v465_v47 = vadd.f32 %v503_v45, %v440_v46  ;;  %v563_v48 = vpop.f32.mrb[5].mxu0 }
 0x237   :  { %v443_v49 = vpop.f32.mrb[6].mxu0 }
 0x238   :  { %466 = vst [vmem:[#allocation14] sm:$0xff] %v465_v47  ;;  %v564_v50 = vpop.f32.mrb[7].mxu0 }
 0x239   :  { %731 = shalt.err (!%p728_p10)
}
 0x23a   :  { %s732_s8 = scalar_lea.hbm %s939_s9, 128 }
 0x23b   :  { %p733_p11 = scmp.ne.s32.totalorder %s939_s9, %s732_s8  ;;  %p736_p12 = scmp.lt.u32.totalorder %s732_s8, %s939_s9 }
 0x23d   :  { %p738_p13 = pnand %p736_p12, %p733_p11 }
 0x23f   :  { %741 = shalt.err (!%p738_p13)
}
 0x240   :  { %476 = dma.vmem_to_hbm [thread:$0]  %s474_s20, 128, %s939_s9, [#allocation5]  }
 0x241   :  { %750 = dma.done.wait [#allocation5], 128  }
 0x242   :  { %751 = vsyncadd [#allocation5], 4294967168 }
 0x243   :  { %480 = vsyncpa [#allocation4], 1 }
 0x244   :  { %481 = vsyncpa [#allocation7], 1 }
 0x245   :  { %482 = vsyncpa [#allocation10], 1 }
 0x246   :  { %483 = vsyncpa [#allocation13], 1 }
 0x247   :  { %484 = vsyncpa [#allocation5], 1 }

// kernel: tpu_custom_call.1
= control target key start
LH: loop header
LB: loop body
LE: loop exit
PB: predicated region body
PF: predicated region fallthrough
CT: control target
= control target key end

     0   :  { %14 = vsyncpa [#allocation4], 0  ;;  %s930_s0 = inlined_call_operand.hbm [shape: f32[8,32], index: 0, kind: input, shape index: {}]   ;;  %s931_s1 = inlined_call_operand.hbm [shape: f32[8,32], index: 1, kind: input, shape index: {}]   ;;  %s932_s2 = inlined_call_operand.hbm [shape: bf16[32,64], index: 2, kind: input, shape index: {}]   ;;  %s933_s3 = inlined_call_operand.hbm [shape: bf16[32,64], index: 3, kind: input, shape index: {}]   ;;  %s934_s4 = inlined_call_operand.hbm [shape: bf16[32,64], index: 4, kind: input, shape index: {}]   ;;  %s935_s5 = inlined_call_operand.vmem [shape: bf16[32,64], index: 5, kind: input, shape index: {}]   ;;  %s936_s6 = inlined_call_operand.vmem [shape: f32[1,64], index: 6, kind: input, shape index: {}]   ;;  %s937_s7 = inlined_call_operand.hbm [shape: bf16[64,128], index: 7, kind: input, shape index: {}]   ;;  %s938_s8 = inlined_call_operand.vmem [shape: f32[1,128], index: 8, kind: input, shape index: {}]   ;;  %s939_s9 = inlined_call_operand.hbm [shape: f32[8,128], index: 9, kind: output, shape index: {}]  }
   0x1   :  { %15 = vsyncpa [#allocation7], 0 }
   0x2   :  { %16 = vsyncpa [#allocation10], 0 }
   0x3   :  { %17 = vsyncpa [#allocation13], 0 }
   0x4   :  { %18 = vsyncpa [#allocation5], 0  ;;  %s752_s30 = smov [#allocation6]   ;;  %s588_s13 = scalar_lea.hbm %s931_s1, 128 }
   0x5   :  { %s35_s10 = sshll.u32 %s752_s30, 4  ;;  %p589_p0 = scmp.ne.s32.totalorder %s931_s1, %s588_s13  ;;  %s36_s10 = int_to_ptr.vmem [resolvable:$true] %s35_s10 }
   0x6   :  { %p592_p1 = scmp.lt.u32.totalorder %s588_s13, %s931_s1 }
   0x8   :  { %p594_p2 = pnand %p592_p1, %p589_p0 }
   0xa   :  { %597 = shalt.err (!%p594_p2)
}
   0xb   :  { %s598_s18 = scalar_lea.vmem %s36_s10, 128  ;;  %p603_p4 = scmp.lt.s32.totalorder %s36_s10, %s36_s10 }
   0xc   :  { %p599_p3 = scmp.ne.s32.totalorder %s36_s10, %s598_s18  ;;  %p604_p5 = scmp.lt.s32.totalorder %s598_s18, %s598_s18 }
   0xe   :  { %p605_p6 = por %p604_p5, %p603_p4 }
  0x10   :  { %p606_p7 = pnand %p605_p6, %p599_p3 }
  0x12   :  { %609 = shalt.err (!%p606_p7)
}
  0x13   :  { %38 = dma.hbm_to_vmem [thread:$0]  %s931_s1, 128, %s36_s10, [#allocation7]  }
  0x14   :  { %s753_s21 = smov [#allocation9]   ;;  %s754_s23 = smov [#allocation3]  }
  0x15   :  { %s56_s22 = sshll.u32 %s753_s21, 4  ;;  %s25_s24 = sshll.u32 %s754_s23, 4  ;;  %s57_s22 = int_to_ptr.vmem [resolvable:$true] %s56_s22  ;;  %s26_s24 = int_to_ptr.vmem [resolvable:$true] %s25_s24 }
  0x16   :  { %s610_s27 = scalar_lea.hbm %s933_s3, 256 }
  0x17   :  { %p611_p8 = scmp.ne.s32.totalorder %s933_s3, %s610_s27  ;;  %p614_p9 = scmp.lt.u32.totalorder %s610_s27, %s933_s3 }
  0x19   :  { %p616_p10 = pnand %p614_p9, %p611_p8 }
  0x1b   :  { %619 = shalt.err (!%p616_p10)
}
  0x1c   :  { %s620_s1 = scalar_lea.vmem %s57_s22, 256  ;;  %p625_p12 = scmp.lt.s32.totalorder %s57_s22, %s57_s22 }
  0x1d   :  { %p621_p11 = scmp.ne.s32.totalorder %s57_s22, %s620_s1  ;;  %p626_p13 = scmp.lt.s32.totalorder %s620_s1, %s620_s1 }
  0x1f   :  { %p627_p0 = por %p626_p13, %p625_p12 }
  0x21   :  { %p628_p1 = pnand %p627_p0, %p621_p11 }
  0x23   :  { %631 = shalt.err (!%p628_p1)
}
  0x24   :  { %s755_s10 = smov 64   ;;  %s756_s12 = smov 4  }
  0x25   :  { %62 = dma.hbm_to_vmem [thread:$0]  %s933_s3, 256, %s57_s22, [#allocation10], %s755_s10, %s755_s10, %s756_s12  }
  0x26   :  { %s632_s17 = scalar_lea.hbm %s930_s0, 128 }
  0x27   :  { %p633_p2 = scmp.ne.s32.totalorder %s930_s0, %s632_s17  ;;  %p636_p3 = scmp.lt.u32.totalorder %s632_s17, %s930_s0 }
  0x29   :  { %p638_p4 = pnand %p636_p3, %p633_p2 }
  0x2b   :  { %641 = shalt.err (!%p638_p4)
}
  0x2c   :  { %s642_s23 = scalar_lea.vmem %s26_s24, 128  ;;  %p647_p6 = scmp.lt.s32.totalorder %s26_s24, %s26_s24 }
  0x2d   :  { %p643_p5 = scmp.ne.s32.totalorder %s26_s24, %s642_s23  ;;  %p648_p7 = scmp.lt.s32.totalorder %s642_s23, %s642_s23 }
  0x2f   :  { %p649_p8 = por %p648_p7, %p647_p6 }
  0x31   :  { %p650_p9 = pnand %p649_p8, %p643_p5 }
  0x33   :  { %653 = shalt.err (!%p650_p9)
}
  0x34   :  { %28 = dma.hbm_to_vmem [thread:$0]  %s930_s0, 128, %s26_s24, [#allocation4]  }
  0x35   :  { %s757_s25 = smov [#allocation8]   ;;  %s758_s27 = smov [#allocation11]  }
  0x36   :  { %s44_s26 = sshll.u32 %s757_s25, 4  ;;  %s68_s28 = sshll.u32 %s758_s27, 4  ;;  %s45_s26 = int_to_ptr.vmem [resolvable:$true] %s44_s26  ;;  %s69_s28 = int_to_ptr.vmem [resolvable:$true] %s68_s28 }
  0x37   :  { %s654_s11 = scalar_lea.hbm %s932_s2, 256 }
  0x38   :  { %p655_p10 = scmp.ne.s32.totalorder %s932_s2, %s654_s11  ;;  %p658_p11 = scmp.lt.u32.totalorder %s654_s11, %s932_s2 }
  0x3a   :  { %p660_p12 = pnand %p658_p11, %p655_p10 }
  0x3c   :  { %663 = shalt.err (!%p660_p12)
}
  0x3d   :  { %s664_s0 = scalar_lea.vmem %s45_s26, 256  ;;  %p669_p0 = scmp.lt.s32.totalorder %s45_s26, %s45_s26 }
  0x3e   :  { %p665_p13 = scmp.ne.s32.totalorder %s45_s26, %s664_s0  ;;  %p670_p1 = scmp.lt.s32.totalorder %s664_s0, %s664_s0 }
  0x40   :  { %p671_p2 = por %p670_p1, %p669_p0 }
  0x42   :  { %p672_p3 = pnand %p671_p2, %p665_p13 }
  0x44   :  { %675 = shalt.err (!%p672_p3)
}
  0x45   :  { %50 = dma.hbm_to_vmem [thread:$0]  %s932_s2, 256, %s45_s26, [#allocation7], %s755_s10, %s755_s10, %s756_s12  }
  0x46   :  { %s676_s19 = scalar_lea.hbm %s934_s4, 256 }
  0x47   :  { %p677_p4 = scmp.ne.s32.totalorder %s934_s4, %s676_s19  ;;  %p680_p5 = scmp.lt.u32.totalorder %s676_s19, %s934_s4 }
  0x49   :  { %p682_p6 = pnand %p680_p5, %p677_p4 }
  0x4b   :  { %685 = shalt.err (!%p682_p6)
}
  0x4c   :  { %s686_s22 = scalar_lea.vmem %s69_s28, 256  ;;  %p691_p8 = scmp.lt.s32.totalorder %s69_s28, %s69_s28 }
  0x4d   :  { %p687_p7 = scmp.ne.s32.totalorder %s69_s28, %s686_s22  ;;  %p692_p9 = scmp.lt.s32.totalorder %s686_s22, %s686_s22 }
  0x4f   :  { %p693_p10 = por %p692_p9, %p691_p8 }
  0x51   :  { %p694_p11 = pnand %p693_p10, %p687_p7 }
  0x53   :  { %697 = shalt.err (!%p694_p11)
}
  0x54   :  { %74 = dma.hbm_to_vmem [thread:$0]  %s934_s4, 256, %s69_s28, [#allocation10], %s755_s10, %s755_s10, %s756_s12  }
  0x55   :  { %s759_s26 = smov [#allocation12]   ;;  %s698_s11 = scalar_lea.hbm %s937_s7, 512 }
  0x56   :  { %s84_s27 = sshll.u32 %s759_s26, 4  ;;  %p699_p12 = scmp.ne.s32.totalorder %s937_s7, %s698_s11  ;;  %s85_s27 = int_to_ptr.vmem [resolvable:$true] %s84_s27 }
  0x57   :  { %p702_p13 = scmp.lt.u32.totalorder %s698_s11, %s937_s7 }
  0x59   :  { %p704_p0 = pnand %p702_p13, %p699_p12 }
  0x5b   :  { %707 = shalt.err (!%p704_p0)
}
  0x5c   :  { %s708_s0 = scalar_lea.vmem %s85_s27, 512  ;;  %p713_p2 = scmp.lt.s32.totalorder %s85_s27, %s85_s27 }
  0x5d   :  { %p709_p1 = scmp.ne.s32.totalorder %s85_s27, %s708_s0  ;;  %p714_p3 = scmp.lt.s32.totalorder %s708_s0, %s708_s0 }
  0x5f   :  { %p715_p4 = por %p714_p3, %p713_p2 }
  0x61   :  { %p716_p5 = pnand %p715_p4, %p709_p1 }
  0x63   :  { %719 = shalt.err (!%p716_p5)
}
  0x64   :  { %90 = dma.hbm_to_vmem [thread:$0]  %s937_s7, 512, %s85_s27, [#allocation13], %s755_s10, %s755_s10, %s756_s12  }
  0x65   :  { %742 = dma.done.wait [#allocation4], 128  }
  0x66   :  { %743 = vsyncadd [#allocation4], 4294967168 }
  0x67   :  { %744 = dma.done.wait [#allocation7], 384  }
  0x68   :  { %745 = vsyncadd [#allocation7], 4294966912 }
  0x69   :  { %746 = dma.done.wait [#allocation10], 512  }
  0x6a   :  { %747 = vsyncadd [#allocation10], 4294966784 }
  0x6b   :  { %748 = dma.done.wait [#allocation13], 512  }
  0x6c   :  { %749 = vsyncadd [#allocation13], 4294966784  ;;  %v760_v0 = vmov 0.0   ;;  %vm761_vm0 = vmmov 0   ;;  %v576_v1 = vld [vmem:[#allocation9] sm:$0xff]   ;;  %v577_v2 = vld [vmem:[#allocation9 + $0x8] sm:$0xff]  }
  0x6d   :  { %521 = vmatprep.subr.bf16.mxu1 %v760_v0  ;;  %525 = vmatprep.mubr.msk.bf16.mxu1 %vm761_vm0, %v760_v0  ;;  %v112_v3 = vld [vmem:[#allocation3] sm:$0xff]  ;;  %v113_v4 = vld [vmem:[#allocation6] sm:$0xff]  ;;  %v579_v6 = vld [vmem:[#allocation11] sm:$0xff]   ;;  %vm139_vm1 = vcmask 261120   ;;  %vm402_vm2 = vcmask 523264   ;;  %s762_s19 = smov [#allocation14]  }
  0x6e   :  { %537 = vmatprep.subr.bf16.mxu0 %v760_v0  ;;  %541 = vmatprep.mubr.msk.bf16.mxu0 %vm761_vm0, %v760_v0  ;;  %v114_v5 = vsub.f32 %v112_v3, %v113_v4  ;;  %v122_v7 = vpack.c.bf16 %v113_v4, %v113_v4  ;;  %v578_v8 = vld [vmem:[#allocation8] sm:$0xff]   ;;  %v581_v9 = vld [vmem:[#allocation11 + $0x8] sm:$0xff]   ;;  %v117_v13 = vpack.c.bf16 %v112_v3, %v112_v3  ;;  %v584_v18 = vld [vmem:[#allocation12] sm:$0xff]   ;;  %s473_s20 = sshll.u32 %s762_s19, 4  ;;  %s474_s20 = int_to_ptr.vmem [resolvable:$true] %s473_s20 }
  0x6f   :  { %522 = vmatpush3.bf16.msra.mxu1 %v576_v1  ;;  %538 = vmatpush3.bf16.msra.mxu0 %v579_v6  ;;  %v580_v11 = vld [vmem:[#allocation8 + $0x8] sm:$0xff]   ;;  %v582_v14 = vld [vmem:[%s935_s5] sm:$0xff]   ;;  %v116_v15 = vmul.f32 %v113_v4, %v112_v3  ;;  %v585_v19 = vld [vmem:[#allocation12 + $0x8] sm:$0xff]   ;;  %p725_p7 = scmp.lt.s32.totalorder %s474_s20, %s474_s20 }
  0x70   :  { %523 = vmatprep.subr.bf16.mxu1 %v760_v0  ;;  %539 = vmatprep.subr.bf16.mxu0 %v760_v0  ;;  %v115_v10 = vand.u32 2147483647, %v114_v5  ;;  %v583_v16 = vld [vmem:[%s935_s5 + $0x8] sm:$0xff]   ;;  %v586_v20 = vld [vmem:[#allocation12 + $0x10] sm:$0xff]  }
  0x71   :  { %v299_v17 = vpack.c.bf16 %v116_v15, %v116_v15  ;;  %v587_v21 = vld [vmem:[#allocation12 + $0x18] sm:$0xff]   ;;  %v497_v37 = vld [vmem:[%s936_s6] ss:$0 sm:$0xff]  ;;  %s720_s6 = scalar_lea.vmem %s474_s20, 128 }
  0x72   :  { %v238_v12 = vpack.c.bf16 %v115_v10, %v115_v10  ;;  %v503_v45 = vld [vmem:[%s938_s8] ss:$0 sm:$0xff]  ;;  %p721_p6 = scmp.ne.s32.totalorder %s474_s20, %s720_s6  ;;  %p726_p8 = scmp.lt.s32.totalorder %s720_s6, %s720_s6 }
  0x73   :  { %524 = vmatpush3.bf16.msra.mxu1 %v577_v2  ;;  %540 = vmatpush3.bf16.msra.mxu0 %v581_v9 }
  0x74   :  { %529 = vmatprep.subr.bf16.mxu1 %v760_v0  ;;  %553 = vmatprep.subr.bf16.mxu0 %v760_v0  ;;  %p727_p9 = por %p726_p8, %p725_p7 }
  0x76   :  { %526 = vmatmul.mubr.msk.bf16.vlgmr.msra.gmra.mrb[0].mxu1 %vm139_vm1, %v122_v7  ;;  %542 = vmatmul.mubr.msk.bf16.vlgmr.msra.gmra.mrb[0].mxu0 %vm139_vm1, %v238_v12  ;;  %p728_p10 = pnand %p727_p9, %p721_p6 }
  0x77   :  { %530 = vmatpush3.bf16.msra.mxu1 %v578_v8  ;;  %533 = vmatprep.mubr.msk.bf16.mxu1 %vm761_vm0, %v760_v0 }
  0x78   :  { %531 = vmatprep.subr.bf16.mxu1 %v760_v0  ;;  %561 = vmatprep.mubr.msk.bf16.mxu0 %vm761_vm0, %v760_v0 }
  0x79   :  { %554 = vmatpush3.bf16.msra.mxu0 %v584_v18 }
  0x7a   :  { %555 = vmatprep.subr.bf16.mxu0 %v760_v0 }
  0x7b   :  { %532 = vmatpush3.bf16.msra.mxu1 %v580_v11 }
  0x7c   :  { %545 = vmatprep.subr.bf16.mxu1 %v760_v0 }
  0x7d   :  { %556 = vmatpush3.bf16.msra.mxu0 %v585_v19 }
  0x7e   :  { %534 = vmatmul.mubr.msk.bf16.vlgmr.msra.gmra.mrb[4].mxu1 %vm139_vm1, %v117_v13  ;;  %557 = vmatprep.subr.bf16.mxu0 %v760_v0 }
  0x7f   :  { %546 = vmatpush3.bf16.msra.mxu1 %v582_v14  ;;  %549 = vmatprep.mubr.msk.bf16.mxu1 %vm761_vm0, %v760_v0 }
  0x80   :  { %547 = vmatprep.subr.bf16.mxu1 %v760_v0 }
  0x81   :  { %558 = vmatpush3.bf16.msra.mxu0 %v586_v20 }
  0x82   :  { %559 = vmatprep.subr.bf16.mxu0 %v760_v0 }
  0x83   :  { %548 = vmatpush3.bf16.msra.mxu1 %v583_v16 }
  0x85   :  { %560 = vmatpush3.bf16.msra.mxu0 %v587_v21 }
  0x86   :  { %550 = vmatmul.mubr.msk.bf16.vlgmr.msra.gmra.mrb[8].mxu1 %vm139_vm1, %v299_v17 }
 0x149   :  { %v177_v22 = vpop.f32.mrb[0].mxu1  ;;  %v292_v26 = vpop.f32.mrb[0].mxu0 }
 0x14a   :  { %v527_v23 = vpop.f32.mrb[1].mxu1  ;;  %v543_v27 = vpop.f32.mrb[1].mxu0 }
 0x14b   :  { %v180_v24 = vpop.f32.mrb[2].mxu1  ;;  %v295_v28 = vpop.f32.mrb[2].mxu0 }
 0x14c   :  { %v528_v25 = vpop.f32.mrb[3].mxu1  ;;  %v544_v30 = vpop.f32.mrb[3].mxu0 }
 0x151   :  { %v232_v29 = vpop.f32.mrb[4].mxu1 }
 0x152   :  { %v233_v31 = vadd.f32 %v232_v29, %v177_v22  ;;  %v535_v32 = vpop.f32.mrb[5].mxu1 }
 0x153   :  { %v235_v33 = vpop.f32.mrb[6].mxu1 }
 0x154   :  { %v298_v34 = vadd.f32 %v292_v26, %v233_v31  ;;  %v536_v35 = vpop.f32.mrb[7].mxu1 }
 0x159   :  { %v353_v36 = vpop.f32.mrb[8].mxu1 }
 0x15a   :  { %v359_v38 = vadd.f32 %v353_v36, %v298_v34  ;;  %v551_v39 = vpop.f32.mrb[9].mxu1 }
 0x15b   :  { %v356_v40 = vpop.f32.mrb[10].mxu1 }
 0x15c   :  { %v367_v41 = vadd.f32 %v497_v37, %v359_v38  ;;  %v552_v42 = vpop.f32.mrb[11].mxu1 }
 0x15e   :  { %v368_v43 = vmax.f32 %v367_v41, 0.0 }
 0x160   :  { %v369_v44 = vpack.c.bf16 %v368_v43, %v368_v43 }
 0x162   :  { %562 = vmatmul.mubr.msk.bf16.vlgmr.msra.gmra.mrb[4].mxu0 %vm402_vm2, %v369_v44 }
 0x235   :  { %v440_v46 = vpop.f32.mrb[4].mxu0 }
 0x236   :  { %v465_v47 = vadd.f32 %v503_v45, %v440_v46  ;;  %v563_v48 = vpop.f32.mrb[5].mxu0 }
 0x237   :  { %v443_v49 = vpop.f32.mrb[6].mxu0 }
 0x238   :  { %466 = vst [vmem:[#allocation14] sm:$0xff] %v465_v47  ;;  %v564_v50 = vpop.f32.mrb[7].mxu0 }
 0x239   :  { %731 = shalt.err (!%p728_p10)
}
 0x23a   :  { %s732_s8 = scalar_lea.hbm %s939_s9, 128 }
 0x23b   :  { %p733_p11 = scmp.ne.s32.totalorder %s939_s9, %s732_s8  ;;  %p736_p12 = scmp.lt.u32.totalorder %s732_s8, %s939_s9 }
 0x23d   :  { %p738_p13 = pnand %p736_p12, %p733_p11 }
 0x23f   :  { %741 = shalt.err (!%p738_p13)
}
 0x240   :  { %476 = dma.vmem_to_hbm [thread:$0]  %s474_s20, 128, %s939_s9, [#allocation5]  }
 0x241   :  { %750 = dma.done.wait [#allocation5], 128  }
 0x242   :  { %751 = vsyncadd [#allocation5], 4294967168 }
 0x243   :  { %480 = vsyncpa [#allocation4], 1 }
 0x244   :  { %481 = vsyncpa [#allocation7], 1 }
 0x245   :  { %482 = vsyncpa [#allocation10], 1 }
 0x246   :  { %483 = vsyncpa [#allocation13], 1 }
 0x247   :  { %484 = vsyncpa [#allocation5], 1 }

</bundles_post_ra>
